<compile_context>
chip_gen: v7x
topology: tpu7x:2x2x1
jax: 0.10.0
libtpu: 0.0.40
codegen_flags: <defaults>
</compile_context>

<pallas_src>
import functools

import jax
import jax.numpy as jnp
from jax.experimental import pallas as pl
from jax.experimental.pallas import tpu as pltpu


def _round_up(x, m):
    return ((x + m - 1) // m) * m


# ----------------------------------------------------------------------------
# Kernel: one LSTMCell step per grid iteration, state carried in VMEM.
# ----------------------------------------------------------------------------
def lstm_controller_seq_kernel(x_ref, h0_ref, c0_ref, w_ref, b_ref,
                               h_out_ref, c_out_ref, h_scr):
    """Grid axis 0 = timestep.  Weights/bias resident, h/c carried in VMEM.

    Shapes (all padded):
      x_ref     : (1, Bp, Dp)        current timestep's [input|read_vec]
      h0_ref    : (Bp, Hp)           initial hidden state
      c0_ref    : (Bp, Hp)           initial cell state (f32)
      w_ref     : (Dp + Hp, 4*Hp)    stacked [W_ih^T ; W_hh^T], gate-aligned cols
      b_ref     : (1, 4*Hp)          b_ih + b_hh, gate-aligned cols
      h_out_ref : (1, Bp, Hp)        per-step hidden output
      c_out_ref : (Bp, Hp)           final cell state (f32, resident accumulator)
      h_scr     : (Bp, Hp) f32       carried hidden state
    """
    t = pl.program_id(0)

    @pl.when(t == 0)
    def _init():
        h_scr[...] = h0_ref[...].astype(jnp.float32)
        c_out_ref[...] = c0_ref[...].astype(jnp.float32)

    x_t = x_ref[0].astype(jnp.float32)           # (Bp, Dp)
    h = h_scr[...]                               # (Bp, Hp) f32
    c = c_out_ref[...]                           # (Bp, Hp) f32

    # Single fused MXU matmul: [x | h] @ W_cat  -> (Bp, 4*Hp)
    xh = jnp.concatenate([x_t, h], axis=-1)      # lane-aligned concat in VMEM
    gates = jnp.dot(xh, w_ref[...],
                    preferred_element_type=jnp.float32) + b_ref[...]

    Hp = h_scr.shape[1]
    # Gate order matches torch.nn.LSTMCell: [i | f | g | o]; each slice is a
    # 128-lane-aligned block (zero-cost view).
    i_g = jax.nn.sigmoid(gates[:, 0 * Hp:1 * Hp])
    f_g = jax.nn.sigmoid(gates[:, 1 * Hp:2 * Hp])
    g_g = jnp.tanh(gates[:, 2 * Hp:3 * Hp])
    o_g = jax.nn.sigmoid(gates[:, 3 * Hp:4 * Hp])

    c_new = f_g * c + i_g * g_g                  # padded lanes stay exactly 0
    h_new = o_g * jnp.tanh(c_new)

    h_scr[...] = h_new                           # carry (f32)
    c_out_ref[...] = c_new                       # carry (f32), written back once
    h_out_ref[0] = h_new.astype(h_out_ref.dtype)


# ----------------------------------------------------------------------------
# One-time parameter preparation (hoisted off the per-step path).
# ----------------------------------------------------------------------------
def prepare_controller_params(w_ih, w_hh, b_ih, b_hh):
    """Stack/transpose/pad LSTMCell params into the kernel layout.

    w_ih : [4H, D_in], w_hh : [4H, H], b_ih/b_hh : [4H]   (torch layout)
    Returns:
      w_cat : [D_in_pad + H_pad, 4*H_pad] f32
      b_cat : [1, 4*H_pad] f32
    Gate g occupies columns [g*H_pad : g*H_pad + H]; padding rows/cols are 0.
    """
    four_h, d_in = w_ih.shape
    h = four_h // 4
    h_pad = _round_up(h, 128)
    d_pad = _round_up(d_in, 128)

    w_x = jnp.transpose(w_ih).astype(jnp.float32)      # [D_in, 4H]
    w_h = jnp.transpose(w_hh).astype(jnp.float32)      # [H,    4H]
    b = (b_ih + b_hh).astype(jnp.float32).reshape(1, 4 * h)

    w_cat = jnp.zeros((d_pad + h_pad, 4 * h_pad), jnp.float32)
    b_cat = jnp.zeros((1, 4 * h_pad), jnp.float32)
    for g in range(4):
        w_cat = w_cat.at[:d_in, g * h_pad:g * h_pad + h].set(
            w_x[:, g * h:(g + 1) * h])
        w_cat = w_cat.at[d_pad:d_pad + h, g * h_pad:g * h_pad + h].set(
            w_h[:, g * h:(g + 1) * h])
        b_cat = b_cat.at[:, g * h_pad:g * h_pad + h].set(
            b[:, g * h:(g + 1) * h])
    return w_cat, b_cat


# ----------------------------------------------------------------------------
# Forward: whole sequence fused into one pallas_call (grid over timesteps).
# ----------------------------------------------------------------------------
@functools.partial(jax.jit, static_argnames=())
def controller_forward_seq(input_seq, read_vec_seq, h0, c0, w_cat, b_cat):
    """input_seq: [T,B,input_dim], read_vec_seq: [T,B,read_vec_dim],
    h0/c0: [B,H].  Returns (h_seq [T,B,H], h_final [B,H], c_final [B,H])."""
    T, B = input_seq.shape[:2]
    H = h0.shape[1]

    Gp = w_cat.shape[1]
    Hp = Gp // 4
    Dp = w_cat.shape[0] - Hp
    Bp = _round_up(max(B, 8), 8)

    d_in = input_seq.shape[2] + read_vec_seq.shape[2]

    # Per-sequence (amortized over T) preprocessing: concat + pad to aligned tiles.
    x = jnp.concatenate([input_seq.reshape(T, B, -1),
                         read_vec_seq.reshape(T, B, -1)], axis=-1)
    x = jnp.pad(x, ((0, 0), (0, Bp - B), (0, Dp - d_in)))
    h0p = jnp.pad(h0.astype(jnp.float32), ((0, Bp - B), (0, Hp - H)))
    c0p = jnp.pad(c0.astype(jnp.float32), ((0, Bp - B), (0, Hp - H)))

    h_seq_p, c_fin_p = pl.pallas_call(
        lstm_controller_seq_kernel,
        out_shape=(jax.ShapeDtypeStruct((T, Bp, Hp), input_seq.dtype),
                   jax.ShapeDtypeStruct((Bp, Hp), jnp.float32)),
        grid=(T,),
        in_specs=[
            pl.BlockSpec((1, Bp, Dp), lambda t: (t, 0, 0)),   # x[t] streamed
            pl.BlockSpec((Bp, Hp), lambda t: (0, 0)),         # h0 (resident)
            pl.BlockSpec((Bp, Hp), lambda t: (0, 0)),         # c0 (resident)
            pl.BlockSpec((Dp + Hp, Gp), lambda t: (0, 0)),    # weights (resident)
            pl.BlockSpec((1, Gp), lambda t: (0, 0)),          # bias (resident)
        ],
        out_specs=(
            pl.BlockSpec((1, Bp, Hp), lambda t: (t, 0, 0)),   # h per step
            pl.BlockSpec((Bp, Hp), lambda t: (0, 0)),         # c carried/resident
        ),
        scratch_shapes=[pltpu.VMEM((Bp, Hp), jnp.float32)],   # carried h (f32)
        compiler_params=pltpu.CompilerParams(
            dimension_semantics=("arbitrary",)),              # recurrence axis
    )(x, h0p, c0p, w_cat, b_cat)

    h_seq = h_seq_p[:, :B, :H]
    c_fin = c_fin_p[:B, :H]
    return h_seq, h_seq[-1], c_fin


def controller_forward(input_vb, read_vec_vb, h_prev, c_prev, w_cat, b_cat):
    """Single Controller.forward() step (T=1): returns (h_new, c_new)."""
    h_seq, h_new, c_new = controller_forward_seq(
        input_vb[None], read_vec_vb[None], h_prev, c_prev, w_cat, b_cat)
    return h_new, c_new


# ----------------------------------------------------------------------------
# Pure-JAX reference (torch.nn.LSTMCell semantics).
# ----------------------------------------------------------------------------
def reference_forward_seq(input_seq, read_vec_seq, h0, c0,
                          w_ih, w_hh, b_ih, b_hh):
    T, B = input_seq.shape[:2]
    H = h0.shape[1]
    h, c = h0, c0
    hs = []
    for t in range(T):
        x = jnp.concatenate([input_seq[t].reshape(B, -1),
                             read_vec_seq[t].reshape(B, -1)], axis=-1)
        gates = x @ w_ih.T + b_ih + h @ w_hh.T + b_hh
        i_g = jax.nn.sigmoid(gates[:, 0 * H:1 * H])
        f_g = jax.nn.sigmoid(gates[:, 1 * H:2 * H])
        g_g = jnp.tanh(gates[:, 2 * H:3 * H])
        o_g = jax.nn.sigmoid(gates[:, 3 * H:4 * H])
        c = f_g * c + i_g * g_g
        h = o_g * jnp.tanh(c)
        hs.append(h)
    return jnp.stack(hs), h, c


if __name__ == "__main__":
    # Small shapes consistent with Controller.__init__.
    batch_size = 2
    input_dim = 16
    read_vec_dim = 16
    hidden_dim = 32
    T = 8
    D_in = input_dim + read_vec_dim

    key = jax.random.PRNGKey(0)
    k = jax.random.split(key, 6)

    input_seq = jax.random.normal(k[0], (T, batch_size, input_dim), jnp.float32)
    read_vec_seq = jax.random.normal(k[1], (T, batch_size, read_vec_dim),
                                     jnp.float32)

    # LSTMCell parameters (same shapes as torch.nn.LSTMCell).
    scale = 1.0 / jnp.sqrt(hidden_dim)
    w_ih = jax.random.uniform(k[2], (4 * hidden_dim, D_in),
                              jnp.float32, -scale, scale)
    w_hh = jax.random.uniform(k[3], (4 * hidden_dim, hidden_dim),
                              jnp.float32, -scale, scale)
    b_ih = jax.random.uniform(k[4], (4 * hidden_dim,),
                              jnp.float32, -scale, scale)
    b_hh = jax.random.uniform(k[5], (4 * hidden_dim,),
                              jnp.float32, -scale, scale)

    # _reset_states(): hidden/cell states initialized to zeros.
    h0 = jnp.zeros((batch_size, hidden_dim), jnp.float32)
    c0 = jnp.zeros((batch_size, hidden_dim), jnp.float32)

    # One-time parameter packing (off the step path).
    w_cat, b_cat = prepare_controller_params(w_ih, w_hh, b_ih, b_hh)

    # Fused multi-step forward.
    h_seq, h_fin, c_fin = controller_forward_seq(
        input_seq, read_vec_seq, h0, c0, w_cat, b_cat)
    jax.block_until_ready((h_seq, h_fin, c_fin))

    h_seq_ref, h_fin_ref, c_fin_ref = reference_forward_seq(
        input_seq, read_vec_seq, h0, c0, w_ih, w_hh, b_ih, b_hh)

    assert jnp.allclose(h_seq, h_seq_ref, atol=1e-5, rtol=1e-5), "h_seq mismatch"
    assert jnp.allclose(h_fin, h_fin_ref, atol=1e-5, rtol=1e-5), "h_fin mismatch"
    assert jnp.allclose(c_fin, c_fin_ref, atol=1e-5, rtol=1e-5), "c_fin mismatch"

    # Single-step forward (original Controller.forward semantics).
    h1, c1 = controller_forward(input_seq[0], read_vec_seq[0], h0, c0,
                                w_cat, b_cat)
    jax.block_until_ready((h1, c1))
    assert jnp.allclose(h1, h_seq_ref[0], atol=1e-5, rtol=1e-5), "h1 mismatch"

    print("KERNEL_OK")
</pallas_src>

<mosaic_0001>
module attributes {stable_mosaic.version = 11 : i64} {
  func.func @lstm_controller_seq_kernel(%arg0: i32, %arg1: memref<1x8x128xf32, #tpu.memory_space<vmem>>, %arg2: memref<8x128xf32, #tpu.memory_space<vmem>>, %arg3: memref<8x128xf32, #tpu.memory_space<vmem>>, %arg4: memref<256x512xf32, #tpu.memory_space<vmem>>, %arg5: memref<1x512xf32, #tpu.memory_space<vmem>>, %arg6: memref<1x8x128xf32, #tpu.memory_space<vmem>>, %arg7: memref<8x128xf32, #tpu.memory_space<vmem>>, %arg8: memref<8x128xf32, #tpu.memory_space<vmem>>) attributes {dimension_semantics = [#tpu.dimension_semantics<arbitrary>], iteration_bounds = array<i64: 8>, scalar_prefetch = 0 : i64, scratch_operands = 1 : i64, tpu.core_type = #tpu.core_type<tc>, window_params = [{transform_indices = @transform_0, window_bounds = array<i64: 1, 8, 128>}, {pipeline_mode = #tpu.pipeline_mode<synchronous>, transform_indices = @transform_1, window_bounds = array<i64: 8, 128>}, {pipeline_mode = #tpu.pipeline_mode<synchronous>, transform_indices = @transform_2, window_bounds = array<i64: 8, 128>}, {pipeline_mode = #tpu.pipeline_mode<synchronous>, transform_indices = @transform_3, window_bounds = array<i64: 256, 512>}, {pipeline_mode = #tpu.pipeline_mode<synchronous>, transform_indices = @transform_4, window_bounds = array<i64: 1, 512>}, {transform_indices = @transform_5, window_bounds = array<i64: 1, 8, 128>}, {pipeline_mode = #tpu.pipeline_mode<synchronous>, transform_indices = @transform_6, window_bounds = array<i64: 8, 128>}]} {
    %c0_i32 = arith.constant 0 : i32
    %0 = arith.cmpi eq, %arg0, %c0_i32 : i32
    %1 = arith.extui %0 : i1 to i32
    %c0_i32_0 = arith.constant 0 : i32
    %2 = arith.cmpi ne, %1, %c0_i32_0 : i32
    scf.if %2 {
      %c0_21 = arith.constant 0 : index
      %c0_22 = arith.constant 0 : index
      %43 = vector.load %arg2[%c0_21, %c0_22] : memref<8x128xf32, #tpu.memory_space<vmem>>, vector<8x128xf32>
      %c0_23 = arith.constant 0 : index
      %c0_24 = arith.constant 0 : index
      %44 = vector.load %arg8[%c0_23, %c0_24] : memref<8x128xf32, #tpu.memory_space<vmem>>, vector<8x128xf32>
      tpu.vector_store %arg8[%c0_23, %c0_24], %43 {strides = array<i32>} : memref<8x128xf32, #tpu.memory_space<vmem>>, vector<8x128xf32>,
      %c0_25 = arith.constant 0 : index
      %c0_26 = arith.constant 0 : index
      %45 = vector.load %arg3[%c0_25, %c0_26] : memref<8x128xf32, #tpu.memory_space<vmem>>, vector<8x128xf32>
      %c0_27 = arith.constant 0 : index
      %c0_28 = arith.constant 0 : index
      %46 = vector.load %arg7[%c0_27, %c0_28] : memref<8x128xf32, #tpu.memory_space<vmem>>, vector<8x128xf32>
      tpu.vector_store %arg7[%c0_27, %c0_28], %45 {strides = array<i32>} : memref<8x128xf32, #tpu.memory_space<vmem>>, vector<8x128xf32>,
    } else {
    }
    %c0 = arith.constant 0 : index
    %c0_1 = arith.constant 0 : index
    %c0_2 = arith.constant 0 : index
    %3 = vector.load %arg1[%c0, %c0_1, %c0_2] : memref<1x8x128xf32, #tpu.memory_space<vmem>>, vector<1x8x128xf32>
    %4 = vector.shape_cast %3 : vector<1x8x128xf32> to vector<8x128xf32>
    %c0_3 = arith.constant 0 : index
    %c0_4 = arith.constant 0 : index
    %5 = vector.load %arg8[%c0_3, %c0_4] : memref<8x128xf32, #tpu.memory_space<vmem>>, vector<8x128xf32>
    %c0_5 = arith.constant 0 : index
    %c0_6 = arith.constant 0 : index
    %6 = vector.load %arg7[%c0_5, %c0_6] : memref<8x128xf32, #tpu.memory_space<vmem>>, vector<8x128xf32>
    %7 = tpu.concatenate %4, %5 in 1 : vector<8x128xf32>, vector<8x128xf32> -> vector<8x256xf32>
    %c0_7 = arith.constant 0 : index
    %c0_8 = arith.constant 0 : index
    %8 = vector.load %arg4[%c0_7, %c0_8] : memref<256x512xf32, #tpu.memory_space<vmem>>, vector<256x512xf32>
    %cst = arith.constant dense<0.000000e+00> : vector<8x512xf32>
    %9 = tpu.matmul %7, %8, %cst {dimension_numbers = #tpu.dot_dimension_numbers<[1], [0], [0], [1], [0, 0, 1, 1], [], []>} : vector<8x256xf32>, vector<256x512xf32>, vector<8x512xf32> -> vector<8x512xf32>
    %c0_9 = arith.constant 0 : index
    %c0_10 = arith.constant 0 : index
    %10 = vector.load %arg5[%c0_9, %c0_10] : memref<1x512xf32, #tpu.memory_space<vmem>>, vector<1x512xf32>
    %11 = vector.broadcast %10 : vector<1x512xf32> to vector<8x512xf32>
    %12 = arith.addf %9, %11 : vector<8x512xf32>
    %13 = vector.extract_strided_slice %12 {offsets = [0, 0], sizes = [8, 128], strides = [1, 1]} : vector<8x512xf32> to vector<8x128xf32>
    %14 = arith.negf %13 : vector<8x128xf32>
    %15 = math.exp %14 : vector<8x128xf32>
    %cst_11 = arith.constant 1.000000e+00 : f32
    %16 = vector.broadcast %cst_11 : f32 to vector<8x128xf32>
    %17 = arith.addf %16, %15 : vector<8x128xf32>
    %18 = arith.divf %16, %17 : vector<8x128xf32>
    %19 = vector.extract_strided_slice %12 {offsets = [0, 128], sizes = [8, 128], strides = [1, 1]} : vector<8x512xf32> to vector<8x128xf32>
    %20 = arith.negf %19 : vector<8x128xf32>
    %21 = math.exp %20 : vector<8x128xf32>
    %cst_12 = arith.constant 1.000000e+00 : f32
    %22 = vector.broadcast %cst_12 : f32 to vector<8x128xf32>
    %23 = arith.addf %22, %21 : vector<8x128xf32>
    %24 = arith.divf %22, %23 : vector<8x128xf32>
    %25 = vector.extract_strided_slice %12 {offsets = [0, 256], sizes = [8, 128], strides = [1, 1]} : vector<8x512xf32> to vector<8x128xf32>
    %26 = math.tanh %25 : vector<8x128xf32>
    %27 = vector.extract_strided_slice %12 {offsets = [0, 384], sizes = [8, 128], strides = [1, 1]} : vector<8x512xf32> to vector<8x128xf32>
    %28 = arith.negf %27 : vector<8x128xf32>
    %29 = math.exp %28 : vector<8x128xf32>
    %cst_13 = arith.constant 1.000000e+00 : f32
    %30 = vector.broadcast %cst_13 : f32 to vector<8x128xf32>
    %31 = arith.addf %30, %29 : vector<8x128xf32>
    %32 = arith.divf %30, %31 : vector<8x128xf32>
    %33 = arith.mulf %24, %6 : vector<8x128xf32>
    %34 = arith.mulf %18, %26 : vector<8x128xf32>
    %35 = arith.addf %33, %34 : vector<8x128xf32>
    %36 = math.tanh %35 : vector<8x128xf32>
    %37 = arith.mulf %32, %36 : vector<8x128xf32>
    %c0_14 = arith.constant 0 : index
    %c0_15 = arith.constant 0 : index
    %38 = vector.load %arg8[%c0_14, %c0_15] : memref<8x128xf32, #tpu.memory_space<vmem>>, vector<8x128xf32>
    tpu.vector_store %arg8[%c0_14, %c0_15], %37 {strides = array<i32>} : memref<8x128xf32, #tpu.memory_space<vmem>>, vector<8x128xf32>,
    %c0_16 = arith.constant 0 : index
    %c0_17 = arith.constant 0 : index
    %39 = vector.load %arg7[%c0_16, %c0_17] : memref<8x128xf32, #tpu.memory_space<vmem>>, vector<8x128xf32>
    tpu.vector_store %arg7[%c0_16, %c0_17], %35 {strides = array<i32>} : memref<8x128xf32, #tpu.memory_space<vmem>>, vector<8x128xf32>,
    %c0_18 = arith.constant 0 : index
    %c0_19 = arith.constant 0 : index
    %c0_20 = arith.constant 0 : index
    %40 = vector.load %arg6[%c0_18, %c0_19, %c0_20] : memref<1x8x128xf32, #tpu.memory_space<vmem>>, vector<1x8x128xf32>
    %41 = vector.shape_cast %40 : vector<1x8x128xf32> to vector<8x128xf32>
    %42 = vector.shape_cast %37 : vector<8x128xf32> to vector<1x8x128xf32>
    tpu.vector_store %arg6[%c0_18, %c0_19, %c0_20], %42 {strides = array<i32>} : memref<1x8x128xf32, #tpu.memory_space<vmem>>, vector<1x8x128xf32>,
    return
  }
  func.func @transform_0(%arg0: i32) -> (i32, i32, i32) {
    %c0_i32 = arith.constant 0 : i32
    %c0_i32_0 = arith.constant 0 : i32
    %c0_i32_1 = arith.constant 0 : i32
    return %arg0, %c0_i32, %c0_i32_0 : i32, i32, i32
  }
  func.func @transform_1(%arg0: i32) -> (i32, i32) {
    %c0_i32 = arith.constant 0 : i32
    %c0_i32_0 = arith.constant 0 : i32
    %c0_i32_1 = arith.constant 0 : i32
    return %c0_i32, %c0_i32_0 : i32, i32
  }
  func.func @transform_2(%arg0: i32) -> (i32, i32) {
    %c0_i32 = arith.constant 0 : i32
    %c0_i32_0 = arith.constant 0 : i32
    %c0_i32_1 = arith.constant 0 : i32
    return %c0_i32, %c0_i32_0 : i32, i32
  }
  func.func @transform_3(%arg0: i32) -> (i32, i32) {
    %c0_i32 = arith.constant 0 : i32
    %c0_i32_0 = arith.constant 0 : i32
    %c0_i32_1 = arith.constant 0 : i32
    return %c0_i32, %c0_i32_0 : i32, i32
  }
  func.func @transform_4(%arg0: i32) -> (i32, i32) {
    %c0_i32 = arith.constant 0 : i32
    %c0_i32_0 = arith.constant 0 : i32
    %c0_i32_1 = arith.constant 0 : i32
    return %c0_i32, %c0_i32_0 : i32, i32
  }
  func.func @transform_5(%arg0: i32) -> (i32, i32, i32) {
    %c0_i32 = arith.constant 0 : i32
    %c0_i32_0 = arith.constant 0 : i32
    %c0_i32_1 = arith.constant 0 : i32
    return %arg0, %c0_i32, %c0_i32_0 : i32, i32, i32
  }
  func.func @transform_6(%arg0: i32) -> (i32, i32) {
    %c0_i32 = arith.constant 0 : i32
    %c0_i32_0 = arith.constant 0 : i32
    %c0_i32_1 = arith.constant 0 : i32
    return %c0_i32, %c0_i32_0 : i32, i32
  }
}

</mosaic_0001>

<bundles_post_ra>
// kernel: controller_forward_seq.1
= control target key start
LH: loop header
LB: loop body
LE: loop exit
PB: predicated region body
PF: predicated region fallthrough
CT: control target
= control target key end

     0   :  { %12 = vsyncpa [#allocation4], 0  ;;  %s919_s21 = smov 0   ;;  %s1002_s0 = inlined_call_operand.vmem [shape: f32[8,8,128], index: 0, kind: input, shape index: {}]   ;;  %s1003_s1 = inlined_call_operand.vmem [shape: f32[8,128], index: 1, kind: input, shape index: {}]   ;;  %s1004_s2 = inlined_call_operand.vmem [shape: f32[8,128], index: 2, kind: input, shape index: {}]   ;;  %s1005_s3 = inlined_call_operand.hbm [shape: f32[256,512], index: 3, kind: input, shape index: {}]   ;;  %s1006_s4 = inlined_call_operand.vmem [shape: f32[1,512], index: 4, kind: input, shape index: {}]   ;;  %s1007_s5 = inlined_call_operand.vmem [shape: f32[8,8,128], index: 5, kind: output, shape index: {0}]   ;;  %s1008_s6 = inlined_call_operand.vmem [shape: f32[8,128], index: 6, kind: output, shape index: {1}]  }
   0x1 LB: > { %s925_s22 = sadd.s32 4294967295, %s879_s21   ;;  %p663_p0 = scmp.ge.s32.totalorder %s879_s21, 1  ;;  %s879_s21 = sphi %s919_s21, %s18_s21  }
   0x2   : > { %p180_p1 = scmp.lt.s32.totalorder %s879_s21, 9  ;;  %s881_s23 = smov [#allocation3]  }
   0x3   : > { %s198_s24 = sshll.u32 %s881_s23, 4  ;;  %p1009_p4 = scmp.eq.s32.totalorder %s925_s22, 0  ;;  %s199_s24 = int_to_ptr.vmem [resolvable:$true] %s198_s24 }
   0x4   : > { %p930_p3 = pnand %p663_p0, %p180_p1  ;;  %s841_s29 = scalar_lea.hbm %s1005_s3, 16384 }
   0x5   : > { %p842_p7 = scmp.ne.s32.totalorder %s1005_s3, %s841_s29  ;;  %p848_p11 = scmp.lt.u32.totalorder %s841_s29, %s1005_s3 }
   0x6   : > { %s1011_s25 = scalar_select %p930_p3, 1, 0 }
   0x7   : > { %p808_p5 = pneg %p930_p3 }
   0x9   : > { %p939_p6 = pnand %p1009_p4, %p808_p5 }
   0xb   : > { %p843_p8 = pneg %p939_p6 }
   0xd   : > { %p844_p9 = pnand %p843_p8, %p842_p7 }
   0xf   : > { %p845_p10 = pneg %p844_p9 }
  0x11   : > { %p850_p12 = pnand %p848_p11, %p845_p10 }
  0x13   : > { %853 = shalt.err (!%p850_p12)
}
  0x14   : > { %s854_s10 = scalar_lea.vmem %s199_s24, 16384  ;;  %p862_p5 = scmp.lt.s32.totalorder %s199_s24, %s199_s24 }
  0x15   : > { %p855_p13 = scmp.ne.s32.totalorder %s199_s24, %s854_s10  ;;  %p863_p2 = scmp.lt.s32.totalorder %s854_s10, %s854_s10 }
  0x17   : > { %p857_p0 = pnand %p855_p13, %p843_p8  ;;  %p864_p4 = por %p863_p2, %p862_p5 }
  0x19   : > { %p858_p1 = pneg %p857_p0 }
  0x1b   : > { %p865_p3 = pnand %p864_p4, %p858_p1 }
  0x1d   : > { %868 = shalt.err (!%p865_p3)
}
  0x1e   : > { %s882_s11 = smov 512   ;;  %s883_s12 = smov 32  }
  0x1f   : > { %811 = dma.hbm_to_vmem [thread:$0]  (!%p939_p6), %s1005_s3, 16384, %s199_s24, [#allocation4], %s882_s11, %s882_s11, %s883_s12  }
  0x20   : > { %p1013_p7 = scmp.ne.s32.totalorder %s1011_s25, 0 }
  0x21   : > { %p1014_p9 = scmp.eq.s32.totalorder (!%p1013_p7), %s925_s22, 0 }
  0x22   : > { %224 = sbr.rel (%p1013_p7) target bundleno = 379 (0x17b), region = 40 }
  0x29   : > { %874 = dma.done.wait (%p1014_p9), [#allocation4], 16384   ;;  %p1015_p8 = pmov %p1014_p9 }
  0x2a   : > { %p252_p2 = scmp.lt.s32.totalorder %s925_s22, 7  ;;  %p1016_p3 = scmp.ne.s32.totalorder %s925_s22, 0 }
  0x2b   : > { %876 = vsyncadd (%p1015_p8), [#allocation4], 4294950912  ;;  %v264_v0 = vld [vmem:[%s1003_s1] sm:$0xff] (!%p1016_p3) }
  0x2c   : > { %s253_s15 = scalar_select %p252_p2, %s925_s22, 7 }
  0x2d   : > { %263 = sbr.rel (%p1016_p3) target bundleno = 52 (0x34), region = 48  ;;  %v266_v1 = vld [vmem:[%s1004_s2] sm:$0xff] (!%p1016_p3)  ;;  %265 = vst [vmem:[#allocation2] sm:$0xff] (!%p1016_p3), %v264_v0 }
  0x2e   : > { %s668_s16 = sshll.u32 %s253_s15, 3  ;;  %267 = vst [vmem:[%s1008_s6] sm:$0xff] (!%p1016_p3), %v266_v1 }
  0x2f   : > { %s970_s19 = scalar_lea.vmem %s1002_s0, %s668_s16  ;;  %s975_s24 = scalar_lea.vmem %s1007_s5, %s668_s16 }
  0x34 PF: > { %v272_v2 = vld [vmem:[#allocation3 + $0x8] sm:$0xff]  ;;  %v271_v4 = vld [vmem:[#allocation3] sm:$0xff]  ;;  %v274_v20 = vld [vmem:[#allocation3 + $0x18] sm:$0xff] }
  0x35   : > { %v276_v3 = vld [vmem:[#allocation3 + $0x28] sm:$0xff]  ;;  %v275_v6 = vld [vmem:[#allocation3 + $0x20] sm:$0xff]  ;;  %v278_v21 = vld [vmem:[#allocation3 + $0x38] sm:$0xff] }
  0x36   : > { %v676_v5 = vpack.c.bf16 %v276_v3, %v272_v2  ;;  %v280_v7 = vld [vmem:[#allocation3 + $0x48] sm:$0xff]  ;;  %v678_v9 = vpack.c.bf16 %v275_v6, %v271_v4  ;;  %v279_v11 = vld [vmem:[#allocation3 + $0x40] sm:$0xff]  ;;  %v740_v23 = vpack.c.bf16 %v278_v21, %v274_v20  ;;  %v273_v24 = vld [vmem:[#allocation3 + $0x10] sm:$0xff] }
  0x37   : > { %v284_v8 = vld [vmem:[#allocation3 + $0x68] sm:$0xff]  ;;  %v283_v12 = vld [vmem:[#allocation3 + $0x60] sm:$0xff]  ;;  %v277_v25 = vld [vmem:[#allocation3 + $0x30] sm:$0xff] }
  0x38   : > { %v680_v10 = vpack.c.bf16 %v284_v8, %v280_v7  ;;  %v288_v13 = vld [vmem:[#allocation3 + $0x88] sm:$0xff]  ;;  %677 = vmatprep.subr.bf16.mxu0 %v676_v5  ;;  %v682_v15 = vpack.c.bf16 %v283_v12, %v279_v11  ;;  %v287_v16 = vld [vmem:[#allocation3 + $0x80] sm:$0xff]  ;;  %v742_v26 = vpack.c.bf16 %v277_v25, %v273_v24  ;;  %741 = vmatprep.subr.bf16.mxu1 %v740_v23  ;;  %v282_v28 = vld [vmem:[#allocation3 + $0x58] sm:$0xff] }
  0x39   : > { %v292_v14 = vld [vmem:[#allocation3 + $0xa8] sm:$0xff]  ;;  %679 = vmatpush1.bf16.msra.mxu0 %v678_v9  ;;  %v291_v17 = vld [vmem:[#allocation3 + $0xa0] sm:$0xff]  ;;  %v286_v29 = vld [vmem:[#allocation3 + $0x78] sm:$0xff] }
  0x3a   : > { %681 = vmatprep.subr.bf16.mxu0 %v680_v10  ;;  %v684_v18 = vpack.c.bf16 %v292_v14, %v288_v13  ;;  %v296_v19 = vld [vmem:[#allocation3 + $0xc8] sm:$0xff]  ;;  %v686_v27 = vpack.c.bf16 %v291_v17, %v287_v16  ;;  %v281_v30 = vld [vmem:[#allocation3 + $0x50] sm:$0xff]  ;;  %v295_v32 = vld [vmem:[#allocation3 + $0xc0] sm:$0xff]  ;;  %743 = vmatpush1.bf16.msra.mxu1 %v742_v26  ;;  %v744_v34 = vpack.c.bf16 %v286_v29, %v282_v28 }
  0x3b   : > { %v300_v22 = vld [vmem:[#allocation3 + $0xe8] sm:$0xff]  ;;  %v299_v33 = vld [vmem:[#allocation3 + $0xe0] sm:$0xff]  ;;  %v285_v35 = vld [vmem:[#allocation3 + $0x70] sm:$0xff] }
  0x3c   : > { %v688_v31 = vpack.c.bf16 %v300_v22, %v296_v19  ;;  %v304_v36 = vld [vmem:[#allocation3 + $0x108] sm:$0xff]  ;;  %v746_v38 = vpack.c.bf16 %v285_v35, %v281_v30  ;;  %v290_v39 = vld [vmem:[#allocation3 + $0x98] sm:$0xff]  ;;  %745 = vmatprep.subr.bf16.mxu1 %v744_v34  ;;  %v289_v41 = vld [vmem:[#allocation3 + $0x90] sm:$0xff]  ;;  %v690_v43 = vpack.c.bf16 %v299_v33, %v295_v32 }
  0x3d   : > { %683 = vmatpush1.bf16.msra.mxu0 %v682_v15  ;;  %v308_v37 = vld [vmem:[#allocation3 + $0x128] sm:$0xff]  ;;  %v294_v40 = vld [vmem:[#allocation3 + $0xb8] sm:$0xff]  ;;  %v293_v42 = vld [vmem:[#allocation3 + $0xb0] sm:$0xff] }
  0x3e   : > { %685 = vmatprep.subr.bf16.mxu0 %v684_v18  ;;  %v303_v44 = vld [vmem:[#allocation3 + $0x100] sm:$0xff]  ;;  %v748_v46 = vpack.c.bf16 %v294_v40, %v290_v39  ;;  %v692_v47 = vpack.c.bf16 %v308_v37, %v304_v36  ;;  %747 = vmatpush1.bf16.msra.mxu1 %v746_v38  ;;  %v312_v48 = vld [vmem:[#allocation3 + $0x148] sm:$0xff]  ;;  %v750_v49 = vpack.c.bf16 %v293_v42, %v289_v41  ;;  %v298_v50 = vld [vmem:[#allocation3 + $0xd8] sm:$0xff] }
  0x3f   : > { %v307_v45 = vld [vmem:[#allocation3 + $0x120] sm:$0xff]  ;;  %v302_v51 = vld [vmem:[#allocation3 + $0xf8] sm:$0xff]  ;;  %v316_v52 = vld [vmem:[#allocation3 + $0x168] sm:$0xff] }
  0x40   : > { %749 = vmatprep.subr.bf16.mxu1 %v748_v46  ;;  %v752_v53 = vpack.c.bf16 %v302_v51, %v298_v50  ;;  %v297_v54 = vld [vmem:[#allocation3 + $0xd0] sm:$0xff]  ;;  %v694_v56 = vpack.c.bf16 %v307_v45, %v303_v44  ;;  %v306_v57 = vld [vmem:[#allocation3 + $0x118] sm:$0xff]  ;;  %v696_v59 = vpack.c.bf16 %v316_v52, %v312_v48  ;;  %v311_v60 = vld [vmem:[#allocation3 + $0x140] sm:$0xff] }
  0x41   : > { %687 = vmatpush1.bf16.msra.mxu0 %v686_v27  ;;  %v301_v55 = vld [vmem:[#allocation3 + $0xf0] sm:$0xff]  ;;  %v310_v58 = vld [vmem:[#allocation3 + $0x138] sm:$0xff]  ;;  %v315_v61 = vld [vmem:[#allocation3 + $0x160] sm:$0xff] }
  0x42   : > { %689 = vmatprep.subr.bf16.mxu0 %v688_v31  ;;  %751 = vmatpush1.bf16.msra.mxu1 %v750_v49  ;;  %v320_v62 = vld [vmem:[#allocation3 + $0x188] sm:$0xff]  ;;  %v754_v63 = vpack.c.bf16 %v301_v55, %v297_v54  ;;  %v756_v1 = vpack.c.bf16 %v310_v58, %v306_v57  ;;  %v305_v2 = vld [vmem:[#allocation3 + $0x110] sm:$0xff]  ;;  %v314_v4 = vld [vmem:[#allocation3 + $0x158] sm:$0xff]  ;;  %v698_v6 = vpack.c.bf16 %v315_v61, %v311_v60 }
  0x43   : > { %v324_v0 = vld [vmem:[#allocation3 + $0x1a8] sm:$0xff]  ;;  %753 = vmatprep.subr.bf16.mxu1 %v752_v53  ;;  %v309_v3 = vld [vmem:[#allocation3 + $0x130] sm:$0xff]  ;;  %v318_v5 = vld [vmem:[#allocation3 + $0x178] sm:$0xff] }
  0x44   : > { %v700_v7 = vpack.c.bf16 %v324_v0, %v320_v62  ;;  %v319_v8 = vld [vmem:[#allocation3 + $0x180] sm:$0xff]  ;;  %v328_v10 = vld [vmem:[#allocation3 + $0x1c8] sm:$0xff]  ;;  %v758_v11 = vpack.c.bf16 %v309_v3, %v305_v2  ;;  %v760_v13 = vpack.c.bf16 %v318_v5, %v314_v4  ;;  %v313_v14 = vld [vmem:[#allocation3 + $0x150] sm:$0xff] }
  0x45   : > { %691 = vmatpush1.bf16.msra.mxu0 %v690_v43  ;;  %v323_v9 = vld [vmem:[#allocation3 + $0x1a0] sm:$0xff]  ;;  %v332_v12 = vld [vmem:[#allocation3 + $0x1e8] sm:$0xff]  ;;  %v317_v15 = vld [vmem:[#allocation3 + $0x170] sm:$0xff] }
  0x46   : > { %693 = vmatprep.subr.bf16.mxu0 %v692_v47  ;;  %755 = vmatpush1.bf16.msra.mxu1 %v754_v63  ;;  %v322_v16 = vld [vmem:[#allocation3 + $0x198] sm:$0xff]  ;;  %v702_v18 = vpack.c.bf16 %v323_v9, %v319_v8  ;;  %v704_v19 = vpack.c.bf16 %v332_v12, %v328_v10  ;;  %v327_v20 = vld [vmem:[#allocation3 + $0x1c0] sm:$0xff]  ;;  %v336_v22 = vld [vmem:[#allocation3 + $0x208] sm:$0xff]  ;;  %v762_v23 = vpack.c.bf16 %v317_v15, %v313_v14 }
  0x47   : > { %757 = vmatprep.subr.bf16.mxu1 %v756_v1  ;;  %v326_v17 = vld [vmem:[#allocation3 + $0x1b8] sm:$0xff]  ;;  %v331_v21 = vld [vmem:[#allocation3 + $0x1e0] sm:$0xff]  ;;  %v340_v24 = vld [vmem:[#allocation3 + $0x228] sm:$0xff] }
  0x48   : > { %v764_v25 = vpack.c.bf16 %v326_v17, %v322_v16  ;;  %v321_v26 = vld [vmem:[#allocation3 + $0x190] sm:$0xff]  ;;  %v330_v28 = vld [vmem:[#allocation3 + $0x1d8] sm:$0xff]  ;;  %v706_v30 = vpack.c.bf16 %v331_v21, %v327_v20  ;;  %v708_v31 = vpack.c.bf16 %v340_v24, %v336_v22  ;;  %v335_v32 = vld [vmem:[#allocation3 + $0x200] sm:$0xff] }
  0x49   : > { %695 = vmatpush1.bf16.msra.mxu0 %v694_v56  ;;  %v325_v27 = vld [vmem:[#allocation3 + $0x1b0] sm:$0xff]  ;;  %v334_v29 = vld [vmem:[#allocation3 + $0x1f8] sm:$0xff]  ;;  %v339_v33 = vld [vmem:[#allocation3 + $0x220] sm:$0xff] }
  0x4a   : > { %697 = vmatprep.subr.bf16.mxu0 %v696_v59  ;;  %759 = vmatpush1.bf16.msra.mxu1 %v758_v11  ;;  %v344_v34 = vld [vmem:[#allocation3 + $0x248] sm:$0xff]  ;;  %v766_v35 = vpack.c.bf16 %v325_v27, %v321_v26  ;;  %v768_v37 = vpack.c.bf16 %v334_v29, %v330_v28  ;;  %v329_v38 = vld [vmem:[#allocation3 + $0x1d0] sm:$0xff]  ;;  %v338_v40 = vld [vmem:[#allocation3 + $0x218] sm:$0xff]  ;;  %v710_v42 = vpack.c.bf16 %v339_v33, %v335_v32 }
  0x4b   : > { %761 = vmatprep.subr.bf16.mxu1 %v760_v13  ;;  %v348_v36 = vld [vmem:[#allocation3 + $0x268] sm:$0xff]  ;;  %v333_v39 = vld [vmem:[#allocation3 + $0x1f0] sm:$0xff]  ;;  %v342_v41 = vld [vmem:[#allocation3 + $0x238] sm:$0xff] }
  0x4c   : > { %v712_v43 = vpack.c.bf16 %v348_v36, %v344_v34  ;;  %v343_v44 = vld [vmem:[#allocation3 + $0x240] sm:$0xff]  ;;  %v352_v46 = vld [vmem:[#allocation3 + $0x288] sm:$0xff]  ;;  %v770_v47 = vpack.c.bf16 %v333_v39, %v329_v38  ;;  %v772_v49 = vpack.c.bf16 %v342_v41, %v338_v40  ;;  %v337_v50 = vld [vmem:[#allocation3 + $0x210] sm:$0xff] }
  0x4d   : > { %699 = vmatpush1.bf16.msra.mxu0 %v698_v6  ;;  %v347_v45 = vld [vmem:[#allocation3 + $0x260] sm:$0xff]  ;;  %v356_v48 = vld [vmem:[#allocation3 + $0x2a8] sm:$0xff]  ;;  %v341_v51 = vld [vmem:[#allocation3 + $0x230] sm:$0xff] }
  0x4e   : > { %701 = vmatprep.subr.bf16.mxu0 %v700_v7  ;;  %763 = vmatpush1.bf16.msra.mxu1 %v762_v23  ;;  %v346_v52 = vld [vmem:[#allocation3 + $0x258] sm:$0xff]  ;;  %v714_v54 = vpack.c.bf16 %v347_v45, %v343_v44  ;;  %v351_v55 = vld [vmem:[#allocation3 + $0x280] sm:$0xff]  ;;  %v716_v56 = vpack.c.bf16 %v356_v48, %v352_v46  ;;  %v360_v58 = vld [vmem:[#allocation3 + $0x2c8] sm:$0xff]  ;;  %v774_v60 = vpack.c.bf16 %v341_v51, %v337_v50 }
  0x4f   : > { %765 = vmatprep.subr.bf16.mxu1 %v764_v25  ;;  %v350_v53 = vld [vmem:[#allocation3 + $0x278] sm:$0xff]  ;;  %v355_v57 = vld [vmem:[#allocation3 + $0x2a0] sm:$0xff]  ;;  %v364_v59 = vld [vmem:[#allocation3 + $0x2e8] sm:$0xff] }
  0x50   : > { %v776_v61 = vpack.c.bf16 %v350_v53, %v346_v52  ;;  %v345_v62 = vld [vmem:[#allocation3 + $0x250] sm:$0xff]  ;;  %v269_v0 = vld [vmem:[#allocation2] sm:$0xff]  ;;  %v718_v3 = vpack.c.bf16 %v355_v57, %v351_v55  ;;  %v720_v4 = vpack.c.bf16 %v364_v59, %v360_v58  ;;  %v359_v5 = vld [vmem:[#allocation3 + $0x2c0] sm:$0xff] }
  0x51   : > { %703 = vmatpush1.bf16.msra.mxu0 %v702_v18  ;;  %v349_v63 = vld [vmem:[#allocation3 + $0x270] sm:$0xff]  ;;  %v354_v1 = vld [vmem:[#allocation3 + $0x298] sm:$0xff]  ;;  %485 = vmatprep.mubr.f32.mxu0 %v269_v0  ;;  %v363_v6 = vld [vmem:[#allocation3 + $0x2e0] sm:$0xff] }
  0x52   : > { %705 = vmatprep.subr.bf16.mxu0 %v704_v19  ;;  %767 = vmatpush1.bf16.msra.mxu1 %v766_v35  ;;  %v358_v2 = vld [vmem:[#allocation3 + $0x2b8] sm:$0xff]  ;;  %v368_v7 = vld [vmem:[#allocation3 + $0x308] sm:$0xff]  ;;  %v778_v8 = vpack.c.bf16 %v349_v63, %v345_v62  ;;  %v353_v11 = vld [vmem:[#allocation3 + $0x290] sm:$0xff]  ;;  %v722_v15 = vpack.c.bf16 %v363_v6, %v359_v5 }
  0x53   : > { %769 = vmatprep.subr.bf16.mxu1 %v768_v37  ;;  %556 = vmatprep.mubr.f32.mxu1 %v269_v0  ;;  %v372_v9 = vld [vmem:[#allocation3 + $0x328] sm:$0xff]  ;;  %v780_v10 = vpack.c.bf16 %v358_v2, %v354_v1  ;;  %v357_v12 = vld [vmem:[#allocation3 + $0x2b0] sm:$0xff]  ;;  %v362_v13 = vld [vmem:[#allocation3 + $0x2d8] sm:$0xff] }
  0x54   : > { %v366_v14 = vld [vmem:[#allocation3 + $0x2f8] sm:$0xff]  ;;  %v724_v16 = vpack.c.bf16 %v372_v9, %v368_v7  ;;  %v367_v17 = vld [vmem:[#allocation3 + $0x300] sm:$0xff]  ;;  %v376_v19 = vld [vmem:[#allocation3 + $0x348] sm:$0xff]  ;;  %v782_v20 = vpack.c.bf16 %v357_v12, %v353_v11 }
  0x55   : > { %707 = vmatpush1.bf16.msra.mxu0 %v706_v30  ;;  %v371_v18 = vld [vmem:[#allocation3 + $0x320] sm:$0xff]  ;;  %v380_v21 = vld [vmem:[#allocation3 + $0x368] sm:$0xff]  ;;  %v784_v22 = vpack.c.bf16 %v366_v14, %v362_v13  ;;  %v361_v23 = vld [vmem:[#allocation3 + $0x2d0] sm:$0xff] }
  0x56   : > { %709 = vmatprep.subr.bf16.mxu0 %v708_v31  ;;  %771 = vmatpush1.bf16.msra.mxu1 %v770_v47  ;;  %v365_v24 = vld [vmem:[#allocation3 + $0x2f0] sm:$0xff]  ;;  %v370_v25 = vld [vmem:[#allocation3 + $0x318] sm:$0xff]  ;;  %v726_v27 = vpack.c.bf16 %v371_v18, %v367_v17  ;;  %v728_v28 = vpack.c.bf16 %v380_v21, %v376_v19  ;;  %v375_v29 = vld [vmem:[#allocation3 + $0x340] sm:$0xff] }
  0x57   : > { %773 = vmatprep.subr.bf16.mxu1 %v772_v49  ;;  %v374_v26 = vld [vmem:[#allocation3 + $0x338] sm:$0xff]  ;;  %v379_v30 = vld [vmem:[#allocation3 + $0x360] sm:$0xff]  ;;  %v384_v31 = vld [vmem:[#allocation3 + $0x388] sm:$0xff]  ;;  %v786_v32 = vpack.c.bf16 %v365_v24, %v361_v23 }
  0x58   : > { %v388_v33 = vld [vmem:[#allocation3 + $0x3a8] sm:$0xff]  ;;  %v788_v34 = vpack.c.bf16 %v374_v26, %v370_v25  ;;  %v369_v35 = vld [vmem:[#allocation3 + $0x310] sm:$0xff]  ;;  %v378_v37 = vld [vmem:[#allocation3 + $0x358] sm:$0xff]  ;;  %v730_v39 = vpack.c.bf16 %v379_v30, %v375_v29 }
  0x59   : > { %711 = vmatpush1.bf16.msra.mxu0 %v710_v42  ;;  %v373_v36 = vld [vmem:[#allocation3 + $0x330] sm:$0xff]  ;;  %v382_v38 = vld [vmem:[#allocation3 + $0x378] sm:$0xff]  ;;  %v732_v40 = vpack.c.bf16 %v388_v33, %v384_v31  ;;  %v383_v41 = vld [vmem:[#allocation3 + $0x380] sm:$0xff] }
  0x5a   : > { %713 = vmatprep.subr.bf16.mxu0 %v712_v43  ;;  %775 = vmatpush1.bf16.msra.mxu1 %v774_v60  ;;  %v387_v42 = vld [vmem:[#allocation3 + $0x3a0] sm:$0xff]  ;;  %v392_v43 = vld [vmem:[#allocation3 + $0x3c8] sm:$0xff]  ;;  %v790_v44 = vpack.c.bf16 %v373_v36, %v369_v35  ;;  %v792_v46 = vpack.c.bf16 %v382_v38, %v378_v37  ;;  %v377_v47 = vld [vmem:[#allocation3 + $0x350] sm:$0xff] }
  0x5b   : > { %777 = vmatprep.subr.bf16.mxu1 %v776_v61  ;;  %v396_v45 = vld [vmem:[#allocation3 + $0x3e8] sm:$0xff]  ;;  %v381_v48 = vld [vmem:[#allocation3 + $0x370] sm:$0xff]  ;;  %v386_v49 = vld [vmem:[#allocation3 + $0x398] sm:$0xff]  ;;  %v734_v51 = vpack.c.bf16 %v387_v42, %v383_v41 }
  0x5c   : > { %v390_v50 = vld [vmem:[#allocation3 + $0x3b8] sm:$0xff]  ;;  %v736_v52 = vpack.c.bf16 %v396_v45, %v392_v43  ;;  %v391_v53 = vld [vmem:[#allocation3 + $0x3c0] sm:$0xff]  ;;  %v794_v55 = vpack.c.bf16 %v381_v48, %v377_v47  ;;  %v385_v57 = vld [vmem:[#allocation3 + $0x390] sm:$0xff] }
  0x5d   : > { %715 = vmatpush1.bf16.msra.mxu0 %v714_v54  ;;  %v395_v54 = vld [vmem:[#allocation3 + $0x3e0] sm:$0xff]  ;;  %v389_v58 = vld [vmem:[#allocation3 + $0x3b0] sm:$0xff]  ;;  %v394_v59 = vld [vmem:[#allocation3 + $0x3d8] sm:$0xff] }
  0x5e   : > { %717 = vmatprep.subr.bf16.mxu0 %v716_v56  ;;  %779 = vmatpush1.bf16.msra.mxu1 %v778_v8  ;;  %v796_v56 = vpack.c.bf16 %v390_v50, %v386_v49  ;;  %v398_v60 = vld [vmem:[#allocation3 + $0x3f8] sm:$0xff]  ;;  %v738_v61 = vpack.c.bf16 %v395_v54, %v391_v53  ;;  %v798_v62 = vpack.c.bf16 %v389_v58, %v385_v57  ;;  %v393_v0 = vld [vmem:[#allocation3 + $0x3d0] sm:$0xff] }
  0x5f   : > { %781 = vmatprep.subr.bf16.mxu1 %v780_v10  ;;  %v800_v63 = vpack.c.bf16 %v398_v60, %v394_v59  ;;  %v397_v1 = vld [vmem:[#allocation3 + $0x3f0] sm:$0xff]  ;;  %v268_v2 = vld [vmem:[%s970_s19] sm:$0xff] }
  0x60   : > { %v399_v7 = vld [vmem:[%s1006_s4] sm:$0xf] }
  0x61   : > { %719 = vmatpush1.bf16.msra.mxu0 %v718_v3  ;;  %v802_v3 = vpack.c.bf16 %v397_v1, %v393_v0 }
  0x62   : > { %721 = vmatprep.subr.bf16.mxu0 %v720_v4  ;;  %783 = vmatpush1.bf16.msra.mxu1 %v782_v20  ;;  %v401_v4 = vlaneseq }
  0x63   : > { %785 = vmatprep.subr.bf16.mxu1 %v784_v22 }
  0x64   : > { %v402_v5 = vshrl.u32 %v401_v4, 7 }
  0x65   : > { %723 = vmatpush1.bf16.msra.mxu0 %v722_v15 }
  0x66   : > { %725 = vmatprep.subr.bf16.mxu0 %v724_v16  ;;  %787 = vmatpush1.bf16.msra.mxu1 %v786_v32  ;;  %v403_v6 = vsub.s32 0, %v402_v5  ;;  %v407_v8 = vsub.s32 1, %v402_v5  ;;  %v415_v11 = vsub.s32 3, %v402_v5  ;;  %v411_v19 = vsub.s32 2, %v402_v5  ;;  %v270_v32 = vld [vmem:[%s1008_s6] sm:$0xff] }
  0x67   : > { %789 = vmatprep.subr.bf16.mxu1 %v788_v34 }
  0x68   : > { %v404_v9 = vrot.slane %v399_v7, %v403_v6  ;;  %v408_v10 = vrot.slane %v399_v7, %v407_v8  ;;  %v416_v17 = vrot.slane %v399_v7, %v415_v11  ;;  %v412_v23 = vrot.slane %v399_v7, %v411_v19 }
  0x69   : > { %727 = vmatpush1.bf16.msra.mxu0 %v726_v27 }
  0x6a   : > { %729 = vmatprep.subr.bf16.mxu0 %v728_v28  ;;  %791 = vmatpush1.bf16.msra.mxu1 %v790_v44 }
  0x6b   : > { %793 = vmatprep.subr.bf16.mxu1 %v792_v46 }
  0x6d   : > { %731 = vmatpush1.bf16.msra.mxu0 %v730_v39 }
  0x6e   : > { %733 = vmatprep.subr.bf16.mxu0 %v732_v40  ;;  %795 = vmatpush1.bf16.msra.mxu1 %v794_v55 }
  0x6f   : > { %797 = vmatprep.subr.bf16.mxu1 %v796_v56 }
  0x71   : > { %735 = vmatpush1.bf16.msra.mxu0 %v734_v51 }
  0x72   : > { %737 = vmatprep.subr.bf16.mxu0 %v736_v52  ;;  %799 = vmatpush1.bf16.msra.mxu1 %v798_v62 }
  0x73   : > { %801 = vmatprep.subr.bf16.mxu1 %v800_v63 }
  0x75   : > { %739 = vmatpush1.bf16.msra.mxu0 %v738_v61 }
  0x76   : > { %803 = vmatpush1.bf16.msra.mxu1 %v802_v3 }
  0x78   : > { %486 = vmatmul.mubr.f32.vlgmr.msra.gmra.mrb[0].mxu0 %v268_v2 }
  0x79   : > { %557 = vmatmul.mubr.f32.vlgmr.msra.gmra.mrb[0].mxu1 %v268_v2 }
 0x14b   : > { %v487_v12 = vpop.f32.mrb[0].mxu0 }
 0x14c   : > { %v488_v13 = vadd.f32 %v487_v12, %v404_v9  ;;  %v489_v14 = vpop.f32.mrb[1].mxu0  ;;  %v558_v20 = vpop.f32.mrb[0].mxu1 }
 0x14d   : > { %v490_v15 = vadd.f32 %v489_v14, %v408_v10  ;;  %v560_v21 = vpop.f32.mrb[1].mxu1  ;;  %v559_v25 = vadd.f32 %v558_v20, %v412_v23 }
 0x14e   : > { %v671_v16 = vmul.f32 -1.442695, %v488_v13  ;;  %v561_v22 = vadd.f32 %v560_v21, %v416_v17 }
 0x14f   : > { %v672_v18 = vmul.f32 -1.442695, %v490_v15 }
 0x150   : > { %825 = vpow2.f32 %v671_v16  ;;  %v673_v24 = vmul.f32 -1.442695, %v561_v22 }
 0x151   : > { %827 = vpow2.f32 %v672_v18 }
 0x152   : > { %829 = vpow2.f32 %v673_v24 }
 0x153   : > { %831 = vtanh.f32 %v559_v25 }
 0x15a   : > { %v826_v26 = vpop.eup %825 }
 0x15b   : > { %v828_v27 = vpop.eup %827  ;;  %v566_v28 = vadd.f32 1.0, %v826_v26 }
 0x15c   : > { %v572_v29 = vadd.f32 1.0, %v828_v27  ;;  %v830_v30 = vpop.eup %829 }
 0x15d   : > { %833 = vrcp.f32 %v566_v28  ;;  %v832_v31 = vpop.eup %831  ;;  %v579_v34 = vadd.f32 1.0, %v830_v30 }
 0x15e   : > { %835 = vrcp.f32 %v572_v29 }
 0x15f   : > { %837 = vrcp.f32 %v579_v34 }
 0x167   : > { %v834_v33 = vpop.eup %833 }
 0x168   : > { %v836_v35 = vpop.eup %835  ;;  %v583_v36 = vmul.f32 %v834_v33, %v832_v31 }
 0x169   : > { %v582_v37 = vmul.f32 %v836_v35, %v270_v32  ;;  %v838_v39 = vpop.eup %837 }
 0x16b   : > { %v584_v38 = vadd.f32 %v583_v36, %v582_v37 }
 0x16d   : > { %839 = vtanh.f32 %v584_v38  ;;  %588 = vst [vmem:[%s1008_s6] sm:$0xff] %v584_v38 }
 0x177   : > { %v840_v40 = vpop.eup %839 }
 0x178   : > { %v586_v41 = vmul.f32 %v840_v40, %v838_v39 }
 0x17a   : > { %587 = vst [vmem:[#allocation2] sm:$0xff] %v586_v41  ;;  %589 = vst [vmem:[%s975_s24] sm:$0xff] %v586_v41 }
 0x17b PF: > { %s18_s21 = sadd.s32 1, %s879_s21  }
 0x17c   : > { %p15_p4 = scmp.ge.s32.totalorder %s18_s21, 10  }
 0x17e   :  { %17 = sbr.rel (!%p15_p4) target bundleno = 1 (0x1), region = 87 }
 0x185   :  { %615 = vsyncpa [#allocation4], 1 }
 0x186   :  { %617 = vsyncpa [#allocation4 + $0x1], 1 }

</bundles_post_ra>
